<compile_context>
chip_gen: v7x
topology: tpu7x:2x2x1
jax: 0.10.0
libtpu: 0.0.40
codegen_flags: <defaults>
</compile_context>

<pallas_src>
import numpy as np
import jax
import jax.numpy as jnp
from jax.experimental import pallas as pl
from jax.experimental.pallas import tpu as pltpu


_TARGET_BLOCK_BYTES = 4 << 20   # ~4 MiB activation block (amortizes ~0.35us/step)
_VMEM_LIMIT_BYTES = 32 << 20    # explicit scoped-VMEM request; safe on v5e/v6e/v7x


def make_sinusoidal_pe(max_seq_len: int, d_model: int) -> jnp.ndarray:
    """Reproduces the double-for-loop PE table from the PyTorch __init__."""
    pe = np.zeros((max_seq_len, d_model), dtype=np.float32)
    for pos in range(max_seq_len):
        for i in range(d_model):
            if i % 2 == 0:
                pe[pos, i] = np.sin(pos / 10000 ** (i / d_model))
            else:
                pe[pos, i] = np.cos(pos / 10000 ** ((i - 1) / d_model))
    return jnp.asarray(pe)[None, :, :]  # (1, max_seq_len, d_model)


# ---------------------------------------------------------------------------
# Kernels
# ---------------------------------------------------------------------------
def _add_pe_kernel(pe_ref, x_ref, o_ref):
    # pe_ref: (1, tr, L) float32   x_ref/o_ref: (bt, tr, L)
    # Add in f32, cast once on the store.
    o_ref[...] = (x_ref[...].astype(jnp.float32) + pe_ref[...]).astype(o_ref.dtype)


def _cls_pe_kernel(pe_cls_ref, pe_body_ref, x_ref, o_ref):
    # pe_cls_ref:  (1, 1, D) float32  -- already cls_token + pe[:, 0]
    # pe_body_ref: (1, S, D) float32  -- pe[:, 1:] (sliced once in the wrapper)
    # x_ref:       (bt, S, D)
    # o_ref:       (bt, S+1, D)
    bt = x_ref.shape[0]
    d = o_ref.shape[-1]
    # Two direct stores; no concatenate, no extra full-block temporary.
    o_ref[:, 0:1, :] = jnp.broadcast_to(pe_cls_ref[...], (bt, 1, d)).astype(o_ref.dtype)
    o_ref[:, 1:, :] = (x_ref[...].astype(jnp.float32)
                       + pe_body_ref[...]).astype(o_ref.dtype)


# ---------------------------------------------------------------------------
# Tile choosers
# ---------------------------------------------------------------------------
def _largest_divisor_leq(n, cap):
    """Largest divisor of n that is <= cap (>= 1)."""
    d = max(1, min(n, cap))
    while n % d:
        d -= 1
    return int(d)


def _sublane_tile(rows, cap_rows):
    """Tile for the second-minor axis: full extent if it fits, else the largest
    multiple-of-8 divisor <= cap_rows; falls back to the full extent."""
    if rows <= cap_rows:
        return int(rows)
    t = (cap_rows // 8) * 8
    while t >= 8:
        if rows % t == 0:
            return int(t)
        t -= 8
    return int(rows)


def _batch_tile(B, cap_b):
    """Divisor of B <= cap_b, keeping >= 2 parallel batch steps when B >= 2."""
    bt = _largest_divisor_leq(B, cap_b)
    if B >= 2 and (B // bt) < 2:
        bt = _largest_divisor_leq(B, max(1, B // 2))
    return bt


# ---------------------------------------------------------------------------
# Wrapper
# ---------------------------------------------------------------------------
def positional_encoding(x, pe, cls_token=None):
    """
    x:         (B, S, D)
    pe:        (1, S, D) float table; (1, S+1, D) when cls_token is given
    cls_token: (1, 1, D) or None
    returns:   (B, S(+1), D) in x.dtype
    """
    B, S, D = x.shape
    out_dtype = x.dtype
    itemsize = jnp.dtype(out_dtype).itemsize
    pe = pe.astype(jnp.float32)  # keep table f32; add in f32, cast on store

    if cls_token is None:
        assert pe.shape == (1, S, D)
        # Lane-dense view when possible (single biggest measured lever for D<128).
        if (S * D) % 128 == 0:
            L = 128
            R = (S * D) // 128
            xr = x.reshape(B, R, L)
            per = pe.reshape(1, R, L)
        else:
            L = D
            R = S
            xr = x
            per = pe

        row_bytes = L * itemsize
        tr = _sublane_tile(R, max(1, _TARGET_BLOCK_BYTES // row_bytes))
        bt = _batch_tile(B, max(1, _TARGET_BLOCK_BYTES // (tr * row_bytes)))
        grid = (B // bt, R // tr)

        out = pl.pallas_call(
            _add_pe_kernel,
            out_shape=jax.ShapeDtypeStruct((B, R, L), out_dtype),
            grid_spec=pl.GridSpec(
                grid=grid,
                in_specs=[
                    pl.BlockSpec((1, tr, L), lambda b, r: (0, r, 0)),   # pe (f32)
                    pl.BlockSpec((bt, tr, L), lambda b, r: (b, r, 0)),  # x
                ],
                out_specs=pl.BlockSpec((bt, tr, L), lambda b, r: (b, r, 0)),
            ),
            compiler_params=pltpu.CompilerParams(
                dimension_semantics=("parallel", "parallel"),
                vmem_limit_bytes=_VMEM_LIMIT_BYTES),
        )(per, xr)
        return out.reshape(B, S, D)

    else:
        S_out = S + 1
        assert pe.shape == (1, S_out, D)
        # Batch-invariant CLS row fused with pe[:,0] ONCE in XLA; body table is
        # a 0-aligned slice done once -- no shifted pe copy inside the kernel.
        pe_cls = pe[:, 0:1, :] + cls_token.astype(jnp.float32)   # (1, 1, D) f32
        pe_body = pe[:, 1:, :]                                   # (1, S, D) f32

        per_batch_out = S_out * D * itemsize
        bt = _batch_tile(B, max(1, _TARGET_BLOCK_BYTES // per_batch_out))
        grid = (B // bt,)

        return pl.pallas_call(
            _cls_pe_kernel,
            out_shape=jax.ShapeDtypeStruct((B, S_out, D), out_dtype),
            grid_spec=pl.GridSpec(
                grid=grid,
                in_specs=[
                    pl.BlockSpec((1, 1, D), lambda b: (0, 0, 0)),    # cls + pe[0]
                    pl.BlockSpec((1, S, D), lambda b: (0, 0, 0)),    # pe[1:]
                    pl.BlockSpec((bt, S, D), lambda b: (b, 0, 0)),   # x
                ],
                out_specs=pl.BlockSpec((bt, S_out, D), lambda b: (b, 0, 0)),
            ),
            compiler_params=pltpu.CompilerParams(
                dimension_semantics=("parallel",),
                vmem_limit_bytes=_VMEM_LIMIT_BYTES),
        )(pe_cls, pe_body, x)


# ---------------------------------------------------------------------------
# Main
# ---------------------------------------------------------------------------
if __name__ == "__main__":
    B, D = 2, 32
    key = jax.random.PRNGKey(0)
    kx, kcls, kx2 = jax.random.split(key, 3)

    # ---- Path 1: include_cls_token=True (8 patches + 1 cls) ----------------
    max_seq_len = 9
    S = max_seq_len - 1
    x = jax.random.normal(kx, (B, S, D), dtype=jnp.float32)
    pe = make_sinusoidal_pe(max_seq_len, D)                  # buffer 'pe'
    cls_token = jax.random.normal(kcls, (1, 1, D), dtype=jnp.float32)

    ref_cls = jnp.concatenate(
        [jnp.broadcast_to(cls_token, (B, 1, D)), x], axis=1) + pe
    out_cls = jax.block_until_ready(positional_encoding(x, pe, cls_token))
    assert out_cls.shape == ref_cls.shape
    np.testing.assert_allclose(np.asarray(out_cls), np.asarray(ref_cls),
                               rtol=1e-6, atol=1e-6)

    # ---- Path 2: include_cls_token=False ------------------------------------
    S2 = 8
    x2 = jax.random.normal(kx2, (B, S2, D), dtype=jnp.float32)
    pe2 = make_sinusoidal_pe(S2, D)
    ref_plain = x2 + pe2
    out_plain = jax.block_until_ready(positional_encoding(x2, pe2, None))
    assert out_plain.shape == ref_plain.shape
    np.testing.assert_allclose(np.asarray(out_plain), np.asarray(ref_plain),
                               rtol=1e-6, atol=1e-6)

    print("KERNEL_OK")
</pallas_src>

<mosaic_0001>
module attributes {stable_mosaic.version = 11 : i64} {
  func.func @_cls_pe_kernel(%arg0: i32, %arg1: memref<1x1x32xf32, #tpu.memory_space<vmem>>, %arg2: memref<1x8x32xf32, #tpu.memory_space<vmem>>, %arg3: memref<1x8x32xf32, #tpu.memory_space<vmem>>, %arg4: memref<1x9x32xf32, #tpu.memory_space<vmem>>) attributes {dimension_semantics = [#tpu.dimension_semantics<parallel>], iteration_bounds = array<i64: 2>, scalar_prefetch = 0 : i64, scratch_operands = 0 : i64, tpu.core_type = #tpu.core_type<tc>, window_params = [{pipeline_mode = #tpu.pipeline_mode<synchronous>, transform_indices = @transform_0, window_bounds = array<i64: 1, 1, 32>}, {pipeline_mode = #tpu.pipeline_mode<synchronous>, transform_indices = @transform_1, window_bounds = array<i64: 1, 8, 32>}, {transform_indices = @transform_2, window_bounds = array<i64: 1, 8, 32>}, {transform_indices = @transform_3, window_bounds = array<i64: 1, 9, 32>}]} {
    %c0 = arith.constant 0 : index
    %c0_0 = arith.constant 0 : index
    %c0_1 = arith.constant 0 : index
    %0 = vector.load %arg1[%c0, %c0_0, %c0_1] : memref<1x1x32xf32, #tpu.memory_space<vmem>>, vector<1x1x32xf32>
    %c0_2 = arith.constant 0 : index
    %c0_3 = arith.constant 0 : index
    %c0_4 = arith.constant 0 : index
    %1 = vector.load %arg4[%c0_2, %c0_3, %c0_4] : memref<1x9x32xf32, #tpu.memory_space<vmem>>, vector<1x1x32xf32>
    tpu.vector_store %arg4[%c0_2, %c0_3, %c0_4], %0 {strides = array<i32>} : memref<1x9x32xf32, #tpu.memory_space<vmem>>, vector<1x1x32xf32>,
    %c0_5 = arith.constant 0 : index
    %c0_6 = arith.constant 0 : index
    %c0_7 = arith.constant 0 : index
    %2 = vector.load %arg3[%c0_5, %c0_6, %c0_7] : memref<1x8x32xf32, #tpu.memory_space<vmem>>, vector<1x8x32xf32>
    %c0_8 = arith.constant 0 : index
    %c0_9 = arith.constant 0 : index
    %c0_10 = arith.constant 0 : index
    %3 = vector.load %arg2[%c0_8, %c0_9, %c0_10] : memref<1x8x32xf32, #tpu.memory_space<vmem>>, vector<1x8x32xf32>
    %4 = arith.addf %2, %3 : vector<1x8x32xf32>
    %c0_11 = arith.constant 0 : index
    %c1 = arith.constant 1 : index
    %c0_12 = arith.constant 0 : index
    %5 = vector.load %arg4[%c0_11, %c1, %c0_12] : memref<1x9x32xf32, #tpu.memory_space<vmem>>, vector<1x8x32xf32>
    tpu.vector_store %arg4[%c0_11, %c1, %c0_12], %4 {strides = array<i32>} : memref<1x9x32xf32, #tpu.memory_space<vmem>>, vector<1x8x32xf32>,
    return
  }
  func.func @transform_0(%arg0: i32) -> (i32, i32, i32) {
    %c0_i32 = arith.constant 0 : i32
    %c0_i32_0 = arith.constant 0 : i32
    %c0_i32_1 = arith.constant 0 : i32
    %c0_i32_2 = arith.constant 0 : i32
    return %c0_i32, %c0_i32_0, %c0_i32_1 : i32, i32, i32
  }
  func.func @transform_1(%arg0: i32) -> (i32, i32, i32) {
    %c0_i32 = arith.constant 0 : i32
    %c0_i32_0 = arith.constant 0 : i32
    %c0_i32_1 = arith.constant 0 : i32
    %c0_i32_2 = arith.constant 0 : i32
    return %c0_i32, %c0_i32_0, %c0_i32_1 : i32, i32, i32
  }
  func.func @transform_2(%arg0: i32) -> (i32, i32, i32) {
    %c0_i32 = arith.constant 0 : i32
    %c0_i32_0 = arith.constant 0 : i32
    %c0_i32_1 = arith.constant 0 : i32
    return %arg0, %c0_i32, %c0_i32_0 : i32, i32, i32
  }
  func.func @transform_3(%arg0: i32) -> (i32, i32, i32) {
    %c0_i32 = arith.constant 0 : i32
    %c0_i32_0 = arith.constant 0 : i32
    %c0_i32_1 = arith.constant 0 : i32
    return %arg0, %c0_i32, %c0_i32_0 : i32, i32, i32
  }
}

</mosaic_0001>

<bundles_post_ra>
// kernel: tpu_custom_call.1
= control target key start
LH: loop header
LB: loop body
LE: loop exit
PB: predicated region body
PF: predicated region fallthrough
CT: control target
= control target key end

     0   :  { %8 = vsyncpa [#allocation3], 0  ;;  %s715_s0 = inlined_call_operand.hbm [shape: f32[1,1,32], index: 0, kind: input, shape index: {}]   ;;  %s716_s1 = inlined_call_operand.hbm [shape: f32[1,8,32], index: 1, kind: input, shape index: {}]   ;;  %s717_s2 = inlined_call_operand.hbm [shape: f32[2,8,32], index: 2, kind: input, shape index: {}]   ;;  %s718_s3 = inlined_call_operand.vmem [shape: f32[2,9,32], index: 3, kind: output, shape index: {}]  }
   0x1   :  { %9 = vsyncpa [#allocation5], 0  ;;  %s534_s12 = smov 0   ;;  %s536_s13 = smov 0  }
   0x2   :  { %s538_s14 = smov 0   ;;  %s540_s15 = smov 0  }
   0x3 LB: > { %s553_s16 = sadd.s32 4294967295, %s509_s15   ;;  %p77_p0 = scmp.ne.s32.totalorder %s501_s13, %s497_s12  ;;  %s509_s15 = sphi %s540_s15, %s735_s15   ;;  %s505_s14 = sphi %s538_s14, %s734_s14   ;;  %s501_s13 = sphi %s536_s13, %s733_s13   ;;  %s497_s12 = sphi %s534_s12, %s732_s12  }
   0x4   : > { %p719_p1 = scmp.eq.s32.totalorder %s553_s16, 0  ;;  %p306_p2 = scmp.ge.s32.totalorder %s509_s15, 1 }
   0x5   : > { %p114_p3 = scmp.lt.s32.totalorder %s509_s15, 3  ;;  %s511_s19 = smov [#allocation2]  }
   0x6   : > { %p561_p4 = por %p719_p1, %p77_p0  ;;  %s127_s20 = sshll.u32 %s511_s19, 4  ;;  %s128_s20 = int_to_ptr.vmem [resolvable:$true] %s127_s20 }
   0x7   : > { %p565_p5 = pnand %p306_p2, %p114_p3  ;;  %s512_s21 = smov [#allocation4]  }
   0x8   : > { %s722_s17 = scalar_select %p561_p4, 1, 0 }
   0x9   : > { %s723_s18 = scalar_select %p565_p5, 1, 0 }
   0xa   : > { %p331_p6 = pneg %p565_p5  ;;  %s138_s22 = sshll.u32 %s512_s21, 4  ;;  %s577_s22 = int_to_ptr.vmem [resolvable:$true] %s138_s22 }
   0xb   : > { %s580_s24 = sadd.s32 1, %s509_s15   ;;  %s381_s28 = scalar_lea.hbm %s715_s0, 16 }
   0xc   : > { %p573_p7 = pnand %p331_p6, %p719_p1  ;;  %s61_s25 = ssub.s32 %s509_s15, %s580_s24 }
   0xd   : > { %p382_p8 = scmp.ne.s32.totalorder %s715_s0, %s381_s28  ;;  %p388_p12 = scmp.lt.u32.totalorder %s381_s28, %s715_s0 }
   0xe   : > { %p383_p9 = pneg %p573_p7 }
  0x10   : > { %p384_p10 = pnand %p383_p9, %p382_p8 }
  0x12   : > { %p385_p11 = pneg %p384_p10 }
  0x14   : > { %p390_p13 = pnand %p388_p12, %p385_p11 }
  0x16   : > { %393 = shalt.err (!%p390_p13)
}
  0x17   : > { %s394_s6 = scalar_lea.vmem %s128_s20, 16  ;;  %s401_s7 = scalar_lea.vmem %s128_s20, 32 }
  0x18   : > { %p395_p0 = scmp.ne.s32.totalorder %s128_s20, %s394_s6  ;;  %p402_p6 = scmp.lt.s32.totalorder %s128_s20, %s128_s20 }
  0x19   : > { %p403_p1 = scmp.lt.s32.totalorder %s401_s7, %s394_s6 }
  0x1a   : > { %p397_p2 = pnand %p395_p0, %p383_p9 }
  0x1b   : > { %p404_p4 = por %p403_p1, %p402_p6 }
  0x1c   : > { %p398_p3 = pneg %p397_p2 }
  0x1e   : > { %p405_p5 = pnand %p404_p4, %p398_p3 }
  0x20   : > { %408 = shalt.err (!%p405_p5)
}
  0x21   : > { %334 = dma.hbm_to_vmem [thread:$0]  (!%p573_p7), %s715_s0, 16, %s128_s20, [#allocation3]  }
  0x22   : > { %s409_s12 = scalar_lea.hbm %s716_s1, 128 }
  0x23   : > { %p410_p8 = scmp.ne.s32.totalorder %s716_s1, %s409_s12  ;;  %p416_p5 = scmp.lt.u32.totalorder %s409_s12, %s716_s1 }
  0x25   : > { %p412_p1 = pnand %p410_p8, %p383_p9 }
  0x27   : > { %p413_p4 = pneg %p412_p1 }
  0x29   : > { %p418_p10 = pnand %p416_p5, %p413_p4 }
  0x2b   : > { %421 = shalt.err (!%p418_p10)
}
  0x2c   : > { %s422_s20 = scalar_lea.vmem %s577_s22, 128  ;;  %p430_p0 = scmp.lt.s32.totalorder %s577_s22, %s577_s22 }
  0x2d   : > { %p423_p11 = scmp.ne.s32.totalorder %s577_s22, %s422_s20  ;;  %p431_p2 = scmp.lt.s32.totalorder %s422_s20, %s422_s20 }
  0x2f   : > { %p425_p12 = pnand %p423_p11, %p383_p9  ;;  %p432_p3 = por %p431_p2, %p430_p0 }
  0x31   : > { %p426_p13 = pneg %p425_p12 }
  0x33   : > { %p433_p6 = pnand %p432_p3, %p426_p13 }
  0x35   : > { %436 = shalt.err (!%p433_p6)
}
  0x36   : > { %337 = dma.hbm_to_vmem [thread:$0]  (!%p573_p7), %s716_s1, 128, %s577_s22, [#allocation5]  }
  0x37   : > { %p62_p9 = scmp.eq.s32.totalorder %s61_s25, 0  ;;  %s64_s30 = sadd.s32 1, %s505_s14 }
  0x38   : > { %p71_p8 = scmp.ne.s32.totalorder %s505_s14, %s501_s13  ;;  %p72_p1 = scmp.eq.s32.totalorder %s509_s15, 0 }
  0x39   : > { %s639_s23 = scalar_select %p62_p9, %s505_s14, %s64_s30  }
  0x3a   : > { %p73_p4 = por %p72_p1, %p71_p8  ;;  %p344_p5 = scmp.lt.s32.totalorder %s509_s15, 2 }
  0x3b   : > { %s149_s4 = sand.u32 1, %s509_s15   ;;  %s151_s5 = sand.u32 1, %s505_s14  }
  0x3c   : > { %s310_s6 = sshll.u32 %s151_s5, 3  ;;  %s311_s7 = sshll.u32 %s509_s15, 7 }
  0x3d   : > { %s648_s10 = scalar_lea.hbm %s717_s2, %s311_s7  ;;  %s153_s22 = scalar_lea.vmem [#allocation6], %s310_s6 }
  0x3e   : > { %s160_s25 = sshll.u32 %s153_s22, 4  ;;  %p652_p7 = pnand %p344_p5, %p73_p4  ;;  %s650_s25 = int_to_ptr.vmem [resolvable:$true] %s160_s25 }
  0x3f   : > { %s150_s15 = scalar_lea.sflag [#allocation3], %s149_s4  ;;  %s437_s12 = scalar_lea.hbm %s648_s10, 128 }
  0x40   : > { %p438_p10 = scmp.ne.s32.totalorder %s648_s10, %s437_s12  ;;  %p439_p11 = pneg %p652_p7 }
  0x41   : > { %s442_s26 = scalar_lea.hbm %s717_s2, 256  ;;  %p443_p0 = scmp.lt.u32.totalorder %s648_s10, %s717_s2 }
  0x42   : > { %p440_p12 = pnand %p439_p11, %p438_p10  ;;  %p444_p2 = scmp.lt.u32.totalorder %s442_s26, %s437_s12 }
  0x43   : > { %p446_p6 = scmp.lt.u32.totalorder %s437_s12, %s648_s10 }
  0x44   : > { %p441_p13 = pneg %p440_p12  ;;  %p445_p3 = por %p444_p2, %p443_p0 }
  0x46   : > { %p447_p9 = por %p446_p6, %p445_p3 }
  0x48   : > { %p448_p8 = pnand %p447_p9, %p441_p13 }
  0x4a   : > { %451 = shalt.err (!%p448_p8)
}
  0x4b   : > { %s452_s28 = scalar_lea.vmem %s650_s25, 128  ;;  %s513_s29 = smov [#allocation6]  }
  0x4c   : > { %p453_p1 = scmp.ne.s32.totalorder %s650_s25, %s452_s28  ;;  %s457_s30 = sshll.u32 %s513_s29, 4  ;;  %s458_s30 = int_to_ptr.vmem [resolvable:$false] %s457_s30 }
  0x4d   : > { %s459_s4 = scalar_lea.vmem %s458_s30, 256  ;;  %p460_p10 = scmp.lt.s32.totalorder %s650_s25, %s458_s30 }
  0x4e   : > { %p455_p4 = pnand %p453_p1, %p439_p11  ;;  %p461_p12 = scmp.lt.s32.totalorder %s459_s4, %s452_s28 }
  0x50   : > { %p456_p5 = pneg %p455_p4  ;;  %p462_p0 = por %p461_p12, %p460_p10 }
  0x52   : > { %p463_p2 = pnand %p462_p0, %p456_p5 }
  0x54   : > { %466 = shalt.err (!%p463_p2)
}
  0x55   : > { %341 = dma.hbm_to_vmem [thread:$0]  (!%p652_p7), %s648_s10, 128, %s650_s25, %s150_s15  }
  0x56   : > { %p726_p13 = scmp.ne.s32.totalorder %s723_s18, 0 }
  0x57   : > { %p727_p11 = scmp.eq.s32.totalorder (!%p726_p13), %s553_s16, 0 }
  0x58   : > { %169 = sbr.rel (%p726_p13) target bundleno = 112 (0x70), region = 32 }
  0x5f   : > { %484 = dma.done.wait (%p727_p11), [#allocation3], 16   ;;  %p728_p3 = pmov %p727_p11 }
  0x61   : > { %486 = vsyncadd (%p728_p3), [#allocation3], 4294967280  ;;  %p729_p6 = pmov %p728_p3 }
  0x62   : > { %p730_p9 = pmov %p728_p3 }
  0x63   : > { %488 = dma.done.wait (%p729_p6), [#allocation5], 128  }
  0x64   : > { %490 = vsyncadd (%p730_p9), [#allocation5], 4294967168  ;;  %s179_s5 = sand.u32 1, %s553_s16   ;;  %s181_s6 = sand.u32 1, %s501_s13  }
  0x65   : > { %s315_s7 = sshll.u32 %s181_s6, 3  ;;  %s180_s18 = scalar_lea.sflag [#allocation3], %s179_s5 }
  0x66   : > { %s183_s8 = scalar_lea.vmem [#allocation6], %s315_s7  ;;  %p731_p7 = scmp.ne.s32.totalorder %s722_s17, 0 }
  0x68   : > { %492 = dma.done.wait (%p731_p7), %s180_s18, 128  }
  0x69   : > { %494 = vsyncadd (%p731_p7), %s180_s18, 4294967168  ;;  %p206_p8 = scmp.lt.s32.totalorder %s553_s16, 1  ;;  %vm212_vm0 = vcmask 253952   ;;  %v211_v0 = vld [vmem:[#allocation2] sm:$0x1]  ;;  %v214_v1 = vld [vmem:[%s183_s8] sm:$0xff] }
  0x6a   : > { %v215_v2 = vld [vmem:[#allocation4] sm:$0xff]  ;;  %vm217_vm1 = vcmask 261120  }
  0x6b   : > { %s737_s16 = smov (!%p206_p8, %s553_s16), 1  ;;  %v216_v3 = vadd.f32 %v215_v2, %v214_v1 }
  0x6c   : > { %s320_s9 = sshll.u32 %s737_s16, 4 }
  0x6d   : > { %s210_s25 = scalar_lea.vmem %s718_s3, %s320_s9 }
  0x6e   : > { %213 = vst.msk [vmem:[%s210_s25] sm:$0x1] %vm212_vm0, %v211_v0 }
  0x6f   : > { %218 = vst.msk [vmem:[%s210_s25 + $0x1] sm:$0xff] %vm217_vm1, %v216_v3 }
  0x70 PF: > { %p12_p1 = scmp.ge.s32.totalorder %s580_s24, 4   ;;  %s732_s12 = smov %s501_s13 }
  0x71   : > { %s733_s13 = smov %s505_s14  ;;  %s734_s14 = smov %s639_s23 }
  0x72   : > { %s735_s15 = smov %s580_s24  ;;  %14 = sbr.rel (!%p12_p1) target bundleno = 3 (0x3), region = 79 }
  0x79   :  { %240 = vsyncpa [#allocation3], 1 }
  0x7a   :  { %242 = vsyncpa [#allocation3 + $0x1], 1 }
  0x7b   :  { %243 = vsyncpa [#allocation5], 1 }

</bundles_post_ra>
